<compile_context>
chip_gen: v7x
topology: tpu7x:2x2x1
jax: 0.10.0
libtpu: 0.0.40
codegen_flags: <defaults>
</compile_context>

<pallas_src>
import functools

import jax
import jax.numpy as jnp
from jax import lax
from jax.experimental import pallas as pl
from jax.experimental.pallas import tpu as pltpu

_IGNORE_INDEX = -100  # torch nn.CrossEntropyLoss default


def _round_up(x: int, m: int) -> int:
    return ((x + m - 1) // m) * m


def _vmem_capacity_bytes() -> int:
    """Physical VMEM of the current chip; conservative fallback if unknown."""
    try:
        cap = int(pltpu.get_tpu_info().vmem_capacity_bytes)
        if cap > 0:
            return cap
    except Exception:
        pass
    return 64 << 20  # v7x-sized fallback (smallest current generation)


def _ce_kernel(pred_ref, tgt_ref, out_ref, *, true_b: int, b_tile: int):
    # pred_ref: (b_tile, C) logits, native dtype (f32 or bf16), VMEM
    # tgt_ref:  (b_tile, 1) int32 class indices, VMEM
    # out_ref:  (8, 128) f32 per-tile partials; [0,0]=loss sum, [0,1]=valid count
    i = pl.program_id(0)

    logits = pred_ref[...].astype(jnp.float32)                    # (b_tile, C)
    tgt = tgt_ref[...]                                            # (b_tile, 1)

    # numerically-stable logsumexp over the class (lane) axis
    m = jnp.max(logits, axis=-1, keepdims=True)                   # (b_tile, 1)
    lse = m + jnp.log(jnp.sum(jnp.exp(logits - m), axis=-1, keepdims=True))

    # gather logits[r, tgt[r]] via one-hot select (vectorized; no dynamic gather)
    col_ids = lax.broadcasted_iota(jnp.int32, logits.shape, 1)    # (b_tile, C)
    picked = jnp.sum(jnp.where(col_ids == tgt, logits, 0.0),
                     axis=-1, keepdims=True)                      # (b_tile, 1)

    # mask padded rows (batch pad / ragged last tile) and ignore_index targets
    row_ids = i * b_tile + lax.broadcasted_iota(jnp.int32, (b_tile, 1), 0)
    valid = (row_ids < true_b) & (tgt != _IGNORE_INDEX)           # (b_tile, 1)

    per_example = jnp.where(valid, lse - picked, 0.0)             # (b_tile, 1)
    loss_sum = jnp.sum(per_example)                               # scalar f32
    cnt_sum = jnp.sum(valid.astype(jnp.float32))                  # scalar f32

    # one lane-dense (8, 128) partials block per tile: [0,0]=loss, [0,1]=count
    rows = lax.broadcasted_iota(jnp.int32, (8, 128), 0)
    cols = lax.broadcasted_iota(jnp.int32, (8, 128), 1)
    out_ref[...] = jnp.where((rows == 0) & (cols == 0), loss_sum,
                             jnp.where((rows == 0) & (cols == 1), cnt_sum, 0.0))


def cross_entropy_loss(prediction: jax.Array, target: jax.Array) -> jax.Array:
    """Matches CrossEntropyLoss.forward: prediction (B,T,C), target (B,T,1) int."""
    assert prediction.shape[:-1] == target.shape[:-1]
    assert target.shape[2] == 1
    B, T, C = prediction.shape

    # Last-timestep slice happens here (reads ~B*C from HBM, not B*T*C); the
    # kernel then streams only the data it actually uses, in its native dtype.
    pred_last = prediction[:, -1, :]                       # (B, C)
    tgt_last = target[:, -1, :].astype(jnp.int32)          # (B, 1)

    # Pad the batch to a multiple of 8 sublanes so block dims never exceed the
    # array; padded rows carry ignore_index and are also masked by row index.
    b8 = _round_up(max(B, 1), 8)
    if b8 != B:
        pred_last = jnp.pad(pred_last, ((0, b8 - B), (0, 0)))
        tgt_last = jnp.pad(tgt_last, ((0, b8 - B), (0, 0)),
                           constant_values=_IGNORE_INDEX)

    # Shape/dtype/per-generation-aware batch tile: double-buffered inputs get
    # ~50% of this chip's physical VMEM (128 MiB v5e/v6e, 64 MiB v7x).
    vmem_cap = _vmem_capacity_bytes()
    input_budget = vmem_cap // 2
    itemsize = jnp.dtype(pred_last.dtype).itemsize
    row_bytes = _round_up(C, 128) * itemsize + 128 * 4     # logits row + padded target
    max_rows = max(8, (input_budget // (2 * row_bytes)) // 8 * 8)
    b_tile = min(b8, max_rows)
    num_tiles = pl.cdiv(b8, b_tile)

    kernel = functools.partial(_ce_kernel, true_b=B, b_tile=b_tile)

    partials = pl.pallas_call(
        kernel,
        out_shape=jax.ShapeDtypeStruct((num_tiles * 8, 128), jnp.float32),
        grid=(num_tiles,),
        in_specs=[
            pl.BlockSpec((b_tile, C), lambda i: (i, 0)),
            pl.BlockSpec((b_tile, 1), lambda i: (i, 0)),
        ],
        out_specs=pl.BlockSpec((8, 128), lambda i: (i, 0)),
        compiler_params=pltpu.CompilerParams(
            # Independent per-tile partials -> both TensorCores on v7x.
            dimension_semantics=("parallel",),
            # Raise the scoped VMEM limit to the per-generation budget.
            vmem_limit_bytes=int(vmem_cap * 3 // 4),
        ),
    )(pred_last, tgt_last)
    # TODO(synk): for very large vocabularies (C*itemsize per row beyond the
    # per-generation block budget) add a C grid axis with an online
    # (flash-style) logsumexp instead of shrinking b_tile.

    partials = partials.reshape(num_tiles, 8, 128)
    loss_sum = jnp.sum(partials[:, 0, 0])
    valid_cnt = jnp.sum(partials[:, 0, 1])
    # NaN when every target is ignore_index -> matches torch reduction='mean'.
    return loss_sum / valid_cnt


def _reference(prediction, target):
    """Plain-JAX reference with torch's ignore_index=-100 mean semantics."""
    logits = prediction[:, -1].astype(jnp.float32)
    labels = target[:, -1, 0]
    valid = labels != _IGNORE_INDEX
    lse = jax.nn.logsumexp(logits, axis=-1)
    safe = jnp.clip(labels, 0, logits.shape[-1] - 1)
    picked = jnp.take_along_axis(logits, safe[:, None], axis=-1)[:, 0]
    per = jnp.where(valid, lse - picked, 0.0)
    return per.sum() / valid.sum()


if __name__ == "__main__":
    key = jax.random.PRNGKey(0)
    k1, k2 = jax.random.split(key)

    # Small shapes consistent with the module; B not a multiple of 8 to
    # exercise the batch-pad / row-mask path, plus one ignore_index target.
    B, T, C = 10, 8, 32
    prediction = jax.random.normal(k1, (B, T, C), dtype=jnp.float32)
    target = jax.random.randint(k2, (B, T, 1), 0, C, dtype=jnp.int32)
    target = target.at[3, -1, 0].set(_IGNORE_INDEX)

    loss = cross_entropy_loss(prediction, target)
    jax.block_until_ready(loss)
    ref = _reference(prediction, target)
    assert jnp.allclose(loss, ref, atol=1e-5, rtol=1e-5), (loss, ref)

    # bf16 logits travel HBM->VMEM in native dtype and are cast to f32 in-kernel.
    loss_bf16 = cross_entropy_loss(prediction.astype(jnp.bfloat16), target)
    jax.block_until_ready(loss_bf16)
    ref_bf16 = _reference(prediction.astype(jnp.bfloat16), target)
    assert jnp.allclose(loss_bf16, ref_bf16, atol=2e-2, rtol=2e-2), (loss_bf16, ref_bf16)

    print("KERNEL_OK")
</pallas_src>

<mosaic_0001>
module attributes {stable_mosaic.version = 11 : i64} {
  func.func @_ce_kernel(%arg0: i32, %arg1: memref<16x32xf32, #tpu.memory_space<vmem>>, %arg2: memref<16x1xi32, #tpu.memory_space<vmem>>, %arg3: memref<8x128xf32, #tpu.memory_space<vmem>>) attributes {dimension_semantics = [#tpu.dimension_semantics<parallel>], iteration_bounds = array<i64: 1>, scalar_prefetch = 0 : i64, scratch_operands = 0 : i64, tpu.core_type = #tpu.core_type<tc>, window_params = [{transform_indices = @transform_0, window_bounds = array<i64: 16, 32>}, {transform_indices = @transform_1, window_bounds = array<i64: 16, 1>}, {transform_indices = @transform_2, window_bounds = array<i64: 8, 128>}]} {
    %c0 = arith.constant 0 : index
    %c0_0 = arith.constant 0 : index
    %0 = vector.load %arg1[%c0, %c0_0] : memref<16x32xf32, #tpu.memory_space<vmem>>, vector<16x32xf32>
    %c0_1 = arith.constant 0 : index
    %c0_2 = arith.constant 0 : index
    %1 = vector.load %arg2[%c0_1, %c0_2] : memref<16x1xi32, #tpu.memory_space<vmem>>, vector<16x1xi32>
    %cst = arith.constant dense<0xFF800000> : vector<16xf32>
    %2 = vector.multi_reduction <maximumf>, %0, %cst [1] : vector<16x32xf32> to vector<16xf32>
    %3 = vector.shape_cast %2 : vector<16xf32> to vector<16x1xf32>
    %4 = vector.broadcast %3 : vector<16x1xf32> to vector<16x32xf32>
    %5 = arith.subf %0, %4 : vector<16x32xf32>
    %6 = math.exp %5 : vector<16x32xf32>
    %cst_3 = arith.constant dense<0.000000e+00> : vector<16xf32>
    %7 = vector.multi_reduction <add>, %6, %cst_3 [1] : vector<16x32xf32> to vector<16xf32>
    %8 = vector.shape_cast %7 : vector<16xf32> to vector<16x1xf32>
    %9 = math.log %8 : vector<16x1xf32>
    %10 = arith.addf %3, %9 : vector<16x1xf32>
    %11 = tpu.iota {dimensions = array<i32: 1>} : vector<16x32xi32>
    %12 = vector.broadcast %1 : vector<16x1xi32> to vector<16x32xi32>
    %13 = arith.cmpi eq, %11, %12 : vector<16x32xi32>
    %cst_4 = arith.constant 0.000000e+00 : f32
    %14 = vector.broadcast %cst_4 : f32 to vector<16x32xf32>
    %15 = arith.select %13, %0, %14 : vector<16x32xi1>, vector<16x32xf32>
    %cst_5 = arith.constant dense<0.000000e+00> : vector<16xf32>
    %16 = vector.multi_reduction <add>, %15, %cst_5 [1] : vector<16x32xf32> to vector<16xf32>
    %17 = vector.shape_cast %16 : vector<16xf32> to vector<16x1xf32>
    %c16_i32 = arith.constant 16 : i32
    %18 = arith.muli %arg0, %c16_i32 : i32
    %19 = tpu.iota {dimensions = array<i32: 0>} : vector<16x1xi32>
    %20 = vector.broadcast %18 : i32 to vector<16x1xi32>
    %21 = arith.addi %20, %19 : vector<16x1xi32>
    %c10_i32 = arith.constant 10 : i32
    %22 = vector.broadcast %c10_i32 : i32 to vector<16x1xi32>
    %23 = arith.cmpi slt, %21, %22 : vector<16x1xi32>
    %c-100_i32 = arith.constant -100 : i32
    %24 = vector.broadcast %c-100_i32 : i32 to vector<16x1xi32>
    %25 = arith.cmpi ne, %1, %24 : vector<16x1xi32>
    %26 = arith.andi %23, %25 : vector<16x1xi1>
    %27 = arith.subf %10, %17 : vector<16x1xf32>
    %cst_6 = arith.constant 0.000000e+00 : f32
    %28 = vector.broadcast %cst_6 : f32 to vector<16x1xf32>
    %29 = arith.select %26, %27, %28 : vector<16x1xi1>, vector<16x1xf32>
    %30 = vector.shape_cast %29 : vector<16x1xf32> to vector<1x16x1xf32>
    %cst_7 = arith.constant dense<0.000000e+00> : vector<1xf32>
    %31 = vector.multi_reduction <add>, %30, %cst_7 [1, 2] : vector<1x16x1xf32> to vector<1xf32>
    %32 = vector.shape_cast %31 : vector<1xf32> to vector<1x1x1xf32>
    %33 = vector.extract %32[0, 0, 0] : f32 from vector<1x1x1xf32>
    %34 = arith.extui %26 : vector<16x1xi1> to vector<16x1xi32>
    %35 = arith.sitofp %34 : vector<16x1xi32> to vector<16x1xf32>
    %36 = vector.shape_cast %35 : vector<16x1xf32> to vector<1x16x1xf32>
    %cst_8 = arith.constant dense<0.000000e+00> : vector<1xf32>
    %37 = vector.multi_reduction <add>, %36, %cst_8 [1, 2] : vector<1x16x1xf32> to vector<1xf32>
    %38 = vector.shape_cast %37 : vector<1xf32> to vector<1x1x1xf32>
    %39 = vector.extract %38[0, 0, 0] : f32 from vector<1x1x1xf32>
    %40 = tpu.iota {dimensions = array<i32: 0>} : vector<8x128xi32>
    %41 = tpu.iota {dimensions = array<i32: 1>} : vector<8x128xi32>
    %c0_i32 = arith.constant 0 : i32
    %42 = vector.broadcast %c0_i32 : i32 to vector<8x128xi32>
    %43 = arith.cmpi eq, %40, %42 : vector<8x128xi32>
    %c0_i32_9 = arith.constant 0 : i32
    %44 = vector.broadcast %c0_i32_9 : i32 to vector<8x128xi32>
    %45 = arith.cmpi eq, %41, %44 : vector<8x128xi32>
    %46 = arith.andi %43, %45 : vector<8x128xi1>
    %c0_i32_10 = arith.constant 0 : i32
    %47 = vector.broadcast %c0_i32_10 : i32 to vector<8x128xi32>
    %48 = arith.cmpi eq, %40, %47 : vector<8x128xi32>
    %c1_i32 = arith.constant 1 : i32
    %49 = vector.broadcast %c1_i32 : i32 to vector<8x128xi32>
    %50 = arith.cmpi eq, %41, %49 : vector<8x128xi32>
    %51 = arith.andi %48, %50 : vector<8x128xi1>
    %cst_11 = arith.constant 0.000000e+00 : f32
    %52 = vector.broadcast %39 : f32 to vector<8x128xf32>
    %53 = vector.broadcast %cst_11 : f32 to vector<8x128xf32>
    %54 = arith.select %51, %52, %53 : vector<8x128xi1>, vector<8x128xf32>
    %55 = vector.broadcast %33 : f32 to vector<8x128xf32>
    %56 = arith.select %46, %55, %54 : vector<8x128xi1>, vector<8x128xf32>
    %c0_12 = arith.constant 0 : index
    %c0_13 = arith.constant 0 : index
    %57 = vector.load %arg3[%c0_12, %c0_13] : memref<8x128xf32, #tpu.memory_space<vmem>>, vector<8x128xf32>
    tpu.vector_store %arg3[%c0_12, %c0_13], %56 {strides = array<i32>} : memref<8x128xf32, #tpu.memory_space<vmem>>, vector<8x128xf32>,
    return
  }
  func.func @transform_0(%arg0: i32) -> (i32, i32) {
    %c0_i32 = arith.constant 0 : i32
    %c0_i32_0 = arith.constant 0 : i32
    return %arg0, %c0_i32 : i32, i32
  }
  func.func @transform_1(%arg0: i32) -> (i32, i32) {
    %c0_i32 = arith.constant 0 : i32
    %c0_i32_0 = arith.constant 0 : i32
    return %arg0, %c0_i32 : i32, i32
  }
  func.func @transform_2(%arg0: i32) -> (i32, i32) {
    %c0_i32 = arith.constant 0 : i32
    %c0_i32_0 = arith.constant 0 : i32
    return %arg0, %c0_i32 : i32, i32
  }
}

</mosaic_0001>

<bundles_post_ra>
// kernel: tpu_custom_call.1
= control target key start
LH: loop header
LB: loop body
LE: loop exit
PB: predicated region body
PF: predicated region fallthrough
CT: control target
= control target key end

     0   :  { %vm16_vm0 = vcmask 261120   ;;  %v172_v4 = vmov 0   ;;  %s246_s0 = inlined_call_operand.vmem [shape: f32[16,32], index: 0, kind: input, shape index: {}]   ;;  %s247_s1 = inlined_call_operand.vmem [shape: s32[16,1], index: 1, kind: input, shape index: {}]   ;;  %s248_s2 = inlined_call_operand.hbm [shape: f32[8,128], index: 2, kind: output, shape index: {}]  }
   0x1   :  { %v12_v0 = vld [vmem:[%s246_s0] sm:$0xff]  ;;  %v13_v1 = vld [vmem:[%s246_s0 + $0x8] sm:$0xff]  ;;  %138 = vset.pattern.permute.xlu1 %v172_v4  ;;  %139 = vset.pattern.permute.xlu0 %v172_v4 }
   0x2   :  { %v199_v2 = vld [vmem:[%s247_s1] sm:$0xff]  ;;  %v17_v3 = vsel %vm16_vm0, %v12_v0, -inf }
   0x3   :  { %7 = vsyncpa [#allocation3], 0  ;;  %18 = vmax.xlane.f32.xlu0 %v17_v3  ;;  %44 = vperm.xlu1 %138, %v199_v2   ;;  %v20_v5 = vsel %vm16_vm0, %v13_v1, -inf  ;;  %v15_v6 = vld [vmem:[%s247_s1 + $0x8] sm:$0xff]  ;;  %v41_v11 = vlaneseq  ;;  %vm68_vm3 = vcmp.ne.s32.totalorder %v199_v2, 4294967196  ;;  %v173_v27 = vmov 0.0  }
   0x4   :  { %vm69_vm4 = vcmp.ne.s32.totalorder %v15_v6, 4294967196  ;;  %v129_v28 = vsel %vm68_vm3, 1.0, %v173_v27  ;;  %vm76_vm7 = vcmask 7168   ;;  %s174_s1 = smov [#allocation2]  }
   0x5   :  { %v207_v15 = vand.u32 127, %v41_v11  ;;  %v61_v25 = vshrl.u32 %v41_v11, 7  ;;  %v93_v31 = vsel %vm76_vm7, %v129_v28, 0.0  ;;  %s121_s17 = sshll.u32 %s174_s1, 4  ;;  %s122_s17 = int_to_ptr.vmem [resolvable:$true] %s121_s17 }
   0x6   :  { %s148_s19 = scalar_lea.vmem %s122_s17, 128  ;;  %p153_p1 = scmp.lt.s32.totalorder %s122_s17, %s122_s17 }
   0x7   :  { %21 = vmax.xlane.f32.xlu0 %v20_v5  ;;  %47 = vperm.xlu1 %138, %v15_v6   ;;  %v62_v26 = vadd.s32 8, %v61_v25  ;;  %vm105_vm8 = vcmp.eq.s32.totalorder %v61_v25, 0  ;;  %vm108_vm9 = vcmp.eq.s32.totalorder %v207_v15, 1  ;;  %vm106_vm10 = vcmp.eq.s32.totalorder %v207_v15, 0  ;;  %p149_p0 = scmp.ne.s32.totalorder %s122_s17, %s148_s19  ;;  %p154_p2 = scmp.lt.s32.totalorder %s148_s19, %s148_s19 }
   0x8   :  { %vm109_vm11 = vmand %vm105_vm8, %vm108_vm9 }
   0x9   :  { %vm67_vm5 = vcmp.lt.s32.totalorder %v62_v26, 10  ;;  %vm107_vm12 = vmand %vm105_vm8, %vm106_vm10  ;;  %p155_p3 = por %p154_p2, %p153_p1 }
   0xa   :  { %vm218_vm6 = vmand %vm67_vm5, %vm69_vm4 }
   0xb   :  { %v130_v30 = vsel %vm218_vm6, 1.0, %v173_v27  ;;  %p156_p4 = pnand %p155_p3, %p149_p0 }
   0xc   :  { %v94_v32 = vsel %vm76_vm7, %v130_v30, 0.0 }
   0xd   :  { %v95_v33 = vadd.f32 %v94_v32, %v93_v31 }
  0x82   :  { %v45_v14 = vpop.permute.xlu1 %44 }
  0x83   :  { %vm49_vm1 = vcmp.eq.s32.totalorder %v207_v15, %v45_v14 }
  0x84   :  { %v51_v18 = vsel %vm49_vm1, %v12_v0, 0.0 }
  0x85   :  { %v53_v20 = vsel %vm16_vm0, %v51_v18, 0.0 }
  0x86   :  { %v48_v16 = vpop.permute.xlu1 %47 }
  0x87   :  { %vm50_vm2 = vcmp.eq.s32.totalorder %v207_v15, %v48_v16 }
  0x88   :  { %v52_v22 = vsel %vm50_vm2, %v13_v1, 0.0 }
  0x89   :  { %v56_v24 = vsel %vm16_vm0, %v52_v22, 0.0 }
  0x90   :  { %v19_v7 = vpop.xlane.xlu0 %18 }
  0x91   :  { %v23_v8 = vsub.f32 %v12_v0, %v19_v7 }
  0x93   :  { %v25_v9 = vmul.f32 1.442695, %v23_v8 }
  0x94   :  { %v22_v10 = vpop.xlane.xlu0 %21 }
  0x95   :  { %140 = vpow2.f32 %v25_v9  ;;  %v24_v12 = vsub.f32 %v13_v1, %v22_v10 }
  0x97   :  { %v27_v13 = vmul.f32 1.442695, %v24_v12 }
  0x99   :  { %142 = vpow2.f32 %v27_v13 }
  0x9f   :  { %v141_v17 = vpop.eup %140 }
  0xa0   :  { %v29_v19 = vsel %vm16_vm0, %v141_v17, 0.0 }
  0xa1   :  { %30 = vadd.xlane.f32.xlu0 %v29_v19 }
  0xa3   :  { %v143_v21 = vpop.eup %142 }
  0xa4   :  { %v32_v23 = vsel %vm16_vm0, %v143_v21, 0.0 }
  0xa5   :  { %33 = vadd.xlane.f32.xlu1 %v32_v23  ;;  %54 = vadd.xlane.f32.xlu0 %v53_v20 }
  0xa9   :  { %57 = vadd.xlane.f32.xlu0 %v56_v24 }
 0x12e   :  { %v31_v34 = vpop.xlane.xlu0 %30 }
 0x12f   :  { %144 = vlog2.f32 %v31_v34 }
 0x132   :  { %v34_v35 = vpop.xlane.xlu1 %33  ;;  %v55_v38 = vpop.xlane.xlu0 %54 }
 0x133   :  { %146 = vlog2.f32 %v34_v35 }
 0x136   :  { %v58_v44 = vpop.xlane.xlu0 %57 }
 0x139   :  { %v145_v36 = vpop.eup %144 }
 0x13a   :  { %v36_v37 = vmul.f32 0.6931472, %v145_v36 }
 0x13c   :  { %v39_v39 = vadd.f32 %v36_v37, %v19_v7 }
 0x13d   :  { %v147_v40 = vpop.eup %146 }
 0x13e   :  { %v38_v41 = vmul.f32 0.6931472, %v147_v40  ;;  %v72_v42 = vsub.f32 %v39_v39, %v55_v38 }
 0x140   :  { %v40_v43 = vadd.f32 %v38_v41, %v22_v10  ;;  %v74_v45 = vsel %vm68_vm3, %v72_v42, 0.0 }
 0x141   :  { %v77_v48 = vsel %vm76_vm7, %v74_v45, 0.0 }
 0x142   :  { %v73_v46 = vsub.f32 %v40_v43, %v58_v44 }
 0x144   :  { %v75_v47 = vsel %vm218_vm6, %v73_v46, 0.0 }
 0x145   :  { %v78_v49 = vsel %vm76_vm7, %v75_v47, 0.0 }
 0x146   :  { %v79_v50 = vadd.f32 %v78_v49, %v77_v48 }
 0x148   :  { %80 = vadd.xlane.f32.xlu0 %v79_v50 }
 0x14c   :  { %96 = vadd.xlane.f32.xlu0 %v95_v33 }
 0x1d5   :  { %v81_v51 = vpop.xlane.xlu0 %80 }
 0x1d6   :  { %v82_v52 = vrot.slane %v81_v51, 4 }
 0x1d8   :  { %v83_v53 = vadd.f32 %v82_v52, %v81_v51 }
 0x1d9   :  { %v97_v54 = vpop.xlane.xlu0 %96 }
 0x1da   :  { %v84_v55 = vrot.slane %v83_v53, 2  ;;  %v98_v56 = vrot.slane %v97_v54, 4 }
 0x1dc   :  { %v99_v57 = vadd.f32 %v98_v56, %v97_v54  ;;  %v85_v58 = vadd.f32 %v84_v55, %v83_v53 }
 0x1de   :  { %v100_v59 = vrot.slane %v99_v57, 2  ;;  %v86_v60 = vrot.slane %v85_v58, 1 }
 0x1e0   :  { %v101_v61 = vadd.f32 %v100_v59, %v99_v57  ;;  %v87_v62 = vadd.f32 %v86_v60, %v85_v58 }
 0x1e2   :  { %131 = vpush %v87_v62  ;;  %v102_v63 = vrot.slane %v101_v61, 1 }
 0x1e4   :  { %v103_v0 = vadd.f32 %v102_v63, %v101_v61 }
 0x1e6   :  { %133 = vpush %v103_v0 }
 0x213   :  { %s132_s0 = spop %131 }
 0x214   :  { %v112_v2 = vstv %s132_s0 }
 0x217   :  { %s134_s18 = spop %133 }
 0x218   :  { %v110_v1 = vstv %s134_s18 }
 0x219   :  { %v111_v3 = vsel %vm109_vm11, %v110_v1, 0.0 }
 0x21a   :  { %v113_v4 = vsel %vm107_vm12, %v112_v2, %v111_v3 }
 0x21b   :  { %114 = vst [vmem:[#allocation2] sm:$0xff] %v113_v4 }
 0x21c   :  { %159 = shalt.err (!%p156_p4)
}
 0x21d   :  { %s160_s22 = scalar_lea.hbm %s248_s2, 128 }
 0x21e   :  { %p161_p5 = scmp.ne.s32.totalorder %s248_s2, %s160_s22  ;;  %p164_p6 = scmp.lt.u32.totalorder %s160_s22, %s248_s2 }
 0x220   :  { %p166_p7 = pnand %p164_p6, %p161_p5 }
 0x222   :  { %169 = shalt.err (!%p166_p7)
}
 0x223   :  { %124 = dma.vmem_to_hbm [thread:$0]  %s122_s17, 128, %s248_s2, [#allocation3]  }
 0x224   :  { %170 = dma.done.wait [#allocation3], 128  }
 0x225   :  { %171 = vsyncadd [#allocation3], 4294967168 }
 0x226   :  { %128 = vsyncpa [#allocation3], 1 }

</bundles_post_ra>
